<compile_context>
chip_gen: v5e
topology: v5e:2x2
jax: 0.10.0
libtpu: 0.0.40
codegen_flags: <defaults>
</compile_context>

<pallas_src>
import math
import functools

import jax
import jax.numpy as jnp
from jax.experimental import pallas as pl
from jax.experimental.pallas import tpu as pltpu


def _self_attn_kernel(tgt_ref, qpos_ref,
                      wqk_ref, wv_ref, bqk_ref, bv_ref,
                      wo_ref, bo_ref, gamma_ref, beta_ref,
                      o_ref,
                      *, nhead: int, n_batch: int, eps: float):
    cd = wqk_ref.dtype                        # MXU operand dtype (f32 or bf16)
    f32 = jnp.float32

    x = tgt_ref[...]                          # (NL, E) f32: value + residual source
    qk = x + qpos_ref[...]                    # q = k = tgt + query_pos

    NL, E = x.shape
    dh = E // nhead

    # Fused projections: two full-width MXU pushes + two broadcast bias adds.
    # (1/sqrt(dh) is already folded into the Q half of wqk / bqk.)
    qk_proj = jnp.dot(qk.astype(cd), wqk_ref[...],
                      preferred_element_type=f32) + bqk_ref[...]          # (NL, 2E)
    v_proj = jnp.dot(x.astype(cd), wv_ref[...],
                     preferred_element_type=f32) + bv_ref[...]            # (NL, E)

    q_c = qk_proj[:, :E].astype(cd)           # per-head lane slices below are within-vreg
    k_c = qk_proj[:, E:].astype(cd)
    v_c = v_proj.astype(cd)

    # Per-head scores over ALL rows at once, stacked along sublanes: (H*NL, NL).
    nt = (((1,), (1,)), ((), ()))             # q @ k^T without an explicit transpose
    s_all = jnp.concatenate(
        [jax.lax.dot_general(q_c[:, h * dh:(h + 1) * dh],
                             k_c[:, h * dh:(h + 1) * dh], nt,
                             preferred_element_type=f32)
         for h in range(nhead)], axis=0)

    # Block-diagonal batch mask: flattened row r of (L, N, E).reshape(L*N, E) belongs
    # to batch r % N, so query row and key column must agree modulo n_batch.
    rows = jax.lax.broadcasted_iota(jnp.int32, s_all.shape, 0)
    cols = jax.lax.broadcasted_iota(jnp.int32, s_all.shape, 1)
    s_all = jnp.where((rows % n_batch) == (cols % n_batch), s_all, f32(-1e30))

    # One softmax stream (max / exp / sum / reciprocal) over the whole stacked block.
    s_all = s_all - jnp.max(s_all, axis=-1, keepdims=True)
    p = jnp.exp(s_all)
    p = p * pl.reciprocal(jnp.sum(p, axis=-1, keepdims=True), approx=True)
    p_c = p.astype(cd)

    # Per-head context, lane-concatenated, then ONE output-projection matmul.
    # Masked-out (cross-batch) probabilities are exactly 0, so summing over all NL
    # key rows is correct per batch.
    ctx = jnp.concatenate(
        [jnp.dot(p_c[h * NL:(h + 1) * NL], v_c[:, h * dh:(h + 1) * dh],
                 preferred_element_type=f32)
         for h in range(nhead)], axis=1)                                  # (NL, E)
    attn_out = jnp.dot(ctx.astype(cd), wo_ref[...],
                       preferred_element_type=f32) + bo_ref[...]          # (NL, E)

    # Residual + LayerNorm (dropout p=0.0 -> identity), all in f32.
    res = x + attn_out
    mean = jnp.mean(res, axis=-1, keepdims=True)
    cent = res - mean
    var = jnp.mean(cent * cent, axis=-1, keepdims=True)
    o_ref[...] = cent * jax.lax.rsqrt(var + eps) * gamma_ref[...] + beta_ref[...]


def prepare_self_attention_params(params, *, nhead, compute_dtype=jnp.bfloat16):
    """One-time weight preprocessing (call once per parameter set, not per forward)."""
    w_in = params["in_proj_weight"].astype(jnp.float32)      # (3E, E), rows = out dims
    b_in = params["in_proj_bias"].astype(jnp.float32)        # (3E,)
    E = w_in.shape[1]
    dh = E // nhead
    scale = 1.0 / math.sqrt(dh)

    # Fused (E, 2E) Q|K weight (scale folded into Q), (E, E) V weight, (1, 2E) Q|K bias.
    wqk = jnp.concatenate([w_in[0:E].T * scale, w_in[E:2 * E].T],
                          axis=1).astype(compute_dtype)
    wv = w_in[2 * E:3 * E].T.astype(compute_dtype)
    bqk = jnp.concatenate([b_in[0:E] * scale, b_in[E:2 * E]]).reshape(1, 2 * E)
    bv = b_in[2 * E:3 * E].reshape(1, E)

    wo = params["out_proj_weight"].astype(jnp.float32).T.astype(compute_dtype)  # (E, E)
    bo = params["out_proj_bias"].astype(jnp.float32).reshape(1, E)
    gamma = params["ln_weight"].astype(jnp.float32).reshape(1, E)
    beta = params["ln_bias"].astype(jnp.float32).reshape(1, E)
    return dict(wqk=wqk, wv=wv, bqk=bqk, bv=bv, wo=wo, bo=bo, gamma=gamma, beta=beta)


def self_attention_layer(tgt, prepped, *, nhead, query_pos=None, eps: float = 1e-5):
    """tgt: (L, N, E) seq-first like PyTorch.  Returns (L, N, E)."""
    L, N, E = tgt.shape

    # Contiguous reshape only (no transpose -> no extra HBM round trip around the kernel).
    tgt_flat = tgt.reshape(L * N, E).astype(jnp.float32)
    if query_pos is None:
        qpos_flat = jnp.zeros_like(tgt_flat)
    else:
        qpos_flat = query_pos.reshape(L * N, E).astype(jnp.float32)

    kernel = functools.partial(_self_attn_kernel, nhead=nhead, n_batch=N, eps=eps)
    vmem = pl.BlockSpec(memory_space=pltpu.MemorySpace.VMEM)

    out = pl.pallas_call(
        kernel,
        out_shape=jax.ShapeDtypeStruct((L * N, E), jnp.float32),
        in_specs=[vmem] * 10,
        out_specs=vmem,
    )(tgt_flat, qpos_flat,
      prepped["wqk"], prepped["wv"], prepped["bqk"], prepped["bv"],
      prepped["wo"], prepped["bo"], prepped["gamma"], prepped["beta"])

    return out.reshape(L, N, E)


def _xavier_uniform(key, shape):
    fan_out, fan_in = shape
    bound = math.sqrt(6.0 / (fan_in + fan_out))
    return jax.random.uniform(key, shape, jnp.float32, -bound, bound)


def _reference(tgt, params, nhead, query_pos=None, eps=1e-5):
    """Pure-JAX reference mirroring nn.MultiheadAttention self-attn + residual + LayerNorm."""
    L, N, E = tgt.shape
    dh = E // nhead
    qk = tgt if query_pos is None else tgt + query_pos
    w_in, b_in = params["in_proj_weight"], params["in_proj_bias"]
    q = qk @ w_in[:E].T + b_in[:E]
    k = qk @ w_in[E:2 * E].T + b_in[E:2 * E]
    v = tgt @ w_in[2 * E:].T + b_in[2 * E:]
    qh = q.transpose(1, 0, 2).reshape(N, L, nhead, dh).transpose(0, 2, 1, 3)
    kh = k.transpose(1, 0, 2).reshape(N, L, nhead, dh).transpose(0, 2, 1, 3)
    vh = v.transpose(1, 0, 2).reshape(N, L, nhead, dh).transpose(0, 2, 1, 3)
    s = jnp.einsum("nhld,nhsd->nhls", qh, kh) / math.sqrt(dh)
    p = jax.nn.softmax(s, axis=-1)
    ctx = jnp.einsum("nhls,nhsd->nhld", p, vh)                           # (N,H,L,Dh)
    ctx = ctx.transpose(0, 2, 1, 3).reshape(N, L, E).transpose(1, 0, 2)  # (L,N,E)
    tgt2 = ctx @ params["out_proj_weight"].T + params["out_proj_bias"]
    x = tgt + tgt2
    mu = x.mean(-1, keepdims=True)
    var = ((x - mu) ** 2).mean(-1, keepdims=True)
    return (x - mu) / jnp.sqrt(var + eps) * params["ln_weight"] + params["ln_bias"]


if __name__ == "__main__":
    # Shapes consistent with the module: d_model=32, nhead=4, L=8 tokens, batch N=2.
    L, N, E, H = 8, 2, 32, 4

    key = jax.random.PRNGKey(0)
    k_tgt, k_qp, k_w1, k_w2 = jax.random.split(key, 4)

    tgt = jax.random.normal(k_tgt, (L, N, E), jnp.float32)
    query_pos = jax.random.normal(k_qp, (L, N, E), jnp.float32)

    # Deterministic parameter init (xavier_uniform weights, zero biases, default
    # LayerNorm affine — matches the module's arch=False path with dropout=0).
    params = {
        "in_proj_weight": _xavier_uniform(k_w1, (3 * E, E)),
        "in_proj_bias": jnp.zeros((3 * E,), jnp.float32),
        "out_proj_weight": _xavier_uniform(k_w2, (E, E)),
        "out_proj_bias": jnp.zeros((E,), jnp.float32),
        "ln_weight": jnp.ones((E,), jnp.float32),
        "ln_bias": jnp.zeros((E,), jnp.float32),
    }

    ref = _reference(tgt, params, H, query_pos=query_pos)

    # f32-MXU path (v5e-friendly): tight check of the kernel math.
    prep_f32 = prepare_self_attention_params(params, nhead=H, compute_dtype=jnp.float32)
    out_f32 = jax.block_until_ready(
        self_attention_layer(tgt, prep_f32, nhead=H, query_pos=query_pos))
    assert out_f32.shape == (L, N, E)
    assert jnp.allclose(out_f32, ref, atol=2e-2, rtol=2e-2), \
        float(jnp.max(jnp.abs(out_f32 - ref)))

    # bf16-MXU path (default; v6e/v7x-friendly): looser tolerance for bf16 operands.
    prep_bf16 = prepare_self_attention_params(params, nhead=H, compute_dtype=jnp.bfloat16)
    out_bf16 = jax.block_until_ready(
        self_attention_layer(tgt, prep_bf16, nhead=H, query_pos=query_pos))
    assert out_bf16.shape == (L, N, E)
    assert jnp.allclose(out_bf16, ref, atol=1e-1, rtol=1e-1), \
        float(jnp.max(jnp.abs(out_bf16 - ref)))

    print("KERNEL_OK")
</pallas_src>

<mosaic_0001>
module attributes {stable_mosaic.version = 11 : i64} {
  func.func @_self_attn_kernel(%arg0: memref<16x32xf32, #tpu.memory_space<vmem>>, %arg1: memref<16x32xf32, #tpu.memory_space<vmem>>, %arg2: memref<32x64xf32, #tpu.memory_space<vmem>>, %arg3: memref<32x32xf32, #tpu.memory_space<vmem>>, %arg4: memref<1x64xf32, #tpu.memory_space<vmem>>, %arg5: memref<1x32xf32, #tpu.memory_space<vmem>>, %arg6: memref<32x32xf32, #tpu.memory_space<vmem>>, %arg7: memref<1x32xf32, #tpu.memory_space<vmem>>, %arg8: memref<1x32xf32, #tpu.memory_space<vmem>>, %arg9: memref<1x32xf32, #tpu.memory_space<vmem>>, %arg10: memref<16x32xf32, #tpu.memory_space<vmem>>) attributes {dimension_semantics = [], scalar_prefetch = 0 : i64, scratch_operands = 0 : i64, tpu.core_type = #tpu.core_type<tc>} {
    %c0 = arith.constant 0 : index
    %c0_0 = arith.constant 0 : index
    %0 = vector.load %arg0[%c0, %c0_0] : memref<16x32xf32, #tpu.memory_space<vmem>>, vector<16x32xf32>
    %c0_1 = arith.constant 0 : index
    %c0_2 = arith.constant 0 : index
    %1 = vector.load %arg1[%c0_1, %c0_2] : memref<16x32xf32, #tpu.memory_space<vmem>>, vector<16x32xf32>
    %2 = arith.addf %0, %1 : vector<16x32xf32>
    %c0_3 = arith.constant 0 : index
    %c0_4 = arith.constant 0 : index
    %3 = vector.load %arg2[%c0_3, %c0_4] : memref<32x64xf32, #tpu.memory_space<vmem>>, vector<32x64xf32>
    %cst = arith.constant dense<0.000000e+00> : vector<16x64xf32>
    %4 = tpu.matmul %2, %3, %cst {dimension_numbers = #tpu.dot_dimension_numbers<[1], [0], [0], [1], [0, 0, 1, 1], [], []>} : vector<16x32xf32>, vector<32x64xf32>, vector<16x64xf32> -> vector<16x64xf32>
    %c0_5 = arith.constant 0 : index
    %c0_6 = arith.constant 0 : index
    %5 = vector.load %arg4[%c0_5, %c0_6] : memref<1x64xf32, #tpu.memory_space<vmem>>, vector<1x64xf32>
    %6 = vector.broadcast %5 : vector<1x64xf32> to vector<16x64xf32>
    %7 = arith.addf %4, %6 : vector<16x64xf32>
    %c0_7 = arith.constant 0 : index
    %c0_8 = arith.constant 0 : index
    %8 = vector.load %arg3[%c0_7, %c0_8] : memref<32x32xf32, #tpu.memory_space<vmem>>, vector<32x32xf32>
    %cst_9 = arith.constant dense<0.000000e+00> : vector<16x32xf32>
    %9 = tpu.matmul %0, %8, %cst_9 {dimension_numbers = #tpu.dot_dimension_numbers<[1], [0], [0], [1], [0, 0, 1, 1], [], []>} : vector<16x32xf32>, vector<32x32xf32>, vector<16x32xf32> -> vector<16x32xf32>
    %c0_10 = arith.constant 0 : index
    %c0_11 = arith.constant 0 : index
    %10 = vector.load %arg5[%c0_10, %c0_11] : memref<1x32xf32, #tpu.memory_space<vmem>>, vector<1x32xf32>
    %11 = vector.broadcast %10 : vector<1x32xf32> to vector<16x32xf32>
    %12 = arith.addf %9, %11 : vector<16x32xf32>
    %13 = vector.extract_strided_slice %7 {offsets = [0, 0], sizes = [16, 32], strides = [1, 1]} : vector<16x64xf32> to vector<16x32xf32>
    %14 = vector.extract_strided_slice %7 {offsets = [0, 32], sizes = [16, 32], strides = [1, 1]} : vector<16x64xf32> to vector<16x32xf32>
    %15 = vector.extract_strided_slice %13 {offsets = [0, 0], sizes = [16, 8], strides = [1, 1]} : vector<16x32xf32> to vector<16x8xf32>
    %16 = vector.extract_strided_slice %14 {offsets = [0, 0], sizes = [16, 8], strides = [1, 1]} : vector<16x32xf32> to vector<16x8xf32>
    %cst_12 = arith.constant dense<0.000000e+00> : vector<16x16xf32>
    %17 = tpu.matmul %15, %16, %cst_12 {dimension_numbers = #tpu.dot_dimension_numbers<[1], [1], [0], [0], [0, 0, 1, 0], [], []>} : vector<16x8xf32>, vector<16x8xf32>, vector<16x16xf32> -> vector<16x16xf32>
    %18 = vector.extract_strided_slice %13 {offsets = [0, 8], sizes = [16, 8], strides = [1, 1]} : vector<16x32xf32> to vector<16x8xf32>
    %19 = vector.extract_strided_slice %14 {offsets = [0, 8], sizes = [16, 8], strides = [1, 1]} : vector<16x32xf32> to vector<16x8xf32>
    %cst_13 = arith.constant dense<0.000000e+00> : vector<16x16xf32>
    %20 = tpu.matmul %18, %19, %cst_13 {dimension_numbers = #tpu.dot_dimension_numbers<[1], [1], [0], [0], [0, 0, 1, 0], [], []>} : vector<16x8xf32>, vector<16x8xf32>, vector<16x16xf32> -> vector<16x16xf32>
    %21 = vector.extract_strided_slice %13 {offsets = [0, 16], sizes = [16, 8], strides = [1, 1]} : vector<16x32xf32> to vector<16x8xf32>
    %22 = vector.extract_strided_slice %14 {offsets = [0, 16], sizes = [16, 8], strides = [1, 1]} : vector<16x32xf32> to vector<16x8xf32>
    %cst_14 = arith.constant dense<0.000000e+00> : vector<16x16xf32>
    %23 = tpu.matmul %21, %22, %cst_14 {dimension_numbers = #tpu.dot_dimension_numbers<[1], [1], [0], [0], [0, 0, 1, 0], [], []>} : vector<16x8xf32>, vector<16x8xf32>, vector<16x16xf32> -> vector<16x16xf32>
    %24 = vector.extract_strided_slice %13 {offsets = [0, 24], sizes = [16, 8], strides = [1, 1]} : vector<16x32xf32> to vector<16x8xf32>
    %25 = vector.extract_strided_slice %14 {offsets = [0, 24], sizes = [16, 8], strides = [1, 1]} : vector<16x32xf32> to vector<16x8xf32>
    %cst_15 = arith.constant dense<0.000000e+00> : vector<16x16xf32>
    %26 = tpu.matmul %24, %25, %cst_15 {dimension_numbers = #tpu.dot_dimension_numbers<[1], [1], [0], [0], [0, 0, 1, 0], [], []>} : vector<16x8xf32>, vector<16x8xf32>, vector<16x16xf32> -> vector<16x16xf32>
    %27 = tpu.concatenate %17, %20, %23, %26 in 0 : vector<16x16xf32>, vector<16x16xf32>, vector<16x16xf32>, vector<16x16xf32> -> vector<64x16xf32>
    %28 = tpu.iota {dimensions = array<i32: 0>} : vector<64x16xi32>
    %29 = tpu.iota {dimensions = array<i32: 1>} : vector<64x16xi32>
    %c2_i32 = arith.constant 2 : i32
    %c0_i32 = arith.constant 0 : i32
    %30 = arith.cmpi eq, %c2_i32, %c0_i32 : i32
    %c1_i32 = arith.constant 1 : i32
    %31 = arith.select %30, %c1_i32, %c2_i32 : i32
    %32 = vector.broadcast %31 : i32 to vector<64x16xi32>
    %33 = arith.remsi %28, %32 : vector<64x16xi32>
    %c0_i32_16 = arith.constant 0 : i32
    %34 = vector.broadcast %c0_i32_16 : i32 to vector<64x16xi32>
    %35 = arith.cmpi ne, %33, %34 : vector<64x16xi32>
    %c0_i32_17 = arith.constant 0 : i32
    %36 = vector.broadcast %c0_i32_17 : i32 to vector<64x16xi32>
    %37 = arith.cmpi slt, %33, %36 : vector<64x16xi32>
    %c0_i32_18 = arith.constant 0 : i32
    %38 = arith.cmpi slt, %31, %c0_i32_18 : i32
    %39 = vector.broadcast %38 : i1 to vector<64x16xi1>
    %40 = vector.broadcast %39 : vector<64x16xi1> to vector<64x16xi1>
    %41 = arith.xori %37, %40 : vector<64x16xi1>
    %42 = arith.andi %41, %35 : vector<64x16xi1>
    %43 = vector.broadcast %31 : i32 to vector<64x16xi32>
    %44 = arith.addi %33, %43 : vector<64x16xi32>
    %45 = arith.select %42, %44, %33 : vector<64x16xi1>, vector<64x16xi32>
    %c2_i32_19 = arith.constant 2 : i32
    %c0_i32_20 = arith.constant 0 : i32
    %46 = arith.cmpi eq, %c2_i32_19, %c0_i32_20 : i32
    %c1_i32_21 = arith.constant 1 : i32
    %47 = arith.select %46, %c1_i32_21, %c2_i32_19 : i32
    %48 = vector.broadcast %47 : i32 to vector<64x16xi32>
    %49 = arith.remsi %29, %48 : vector<64x16xi32>
    %c0_i32_22 = arith.constant 0 : i32
    %50 = vector.broadcast %c0_i32_22 : i32 to vector<64x16xi32>
    %51 = arith.cmpi ne, %49, %50 : vector<64x16xi32>
    %c0_i32_23 = arith.constant 0 : i32
    %52 = vector.broadcast %c0_i32_23 : i32 to vector<64x16xi32>
    %53 = arith.cmpi slt, %49, %52 : vector<64x16xi32>
    %c0_i32_24 = arith.constant 0 : i32
    %54 = arith.cmpi slt, %47, %c0_i32_24 : i32
    %55 = vector.broadcast %54 : i1 to vector<64x16xi1>
    %56 = vector.broadcast %55 : vector<64x16xi1> to vector<64x16xi1>
    %57 = arith.xori %53, %56 : vector<64x16xi1>
    %58 = arith.andi %57, %51 : vector<64x16xi1>
    %59 = vector.broadcast %47 : i32 to vector<64x16xi32>
    %60 = arith.addi %49, %59 : vector<64x16xi32>
    %61 = arith.select %58, %60, %49 : vector<64x16xi1>, vector<64x16xi32>
    %62 = arith.cmpi eq, %45, %61 : vector<64x16xi32>
    %cst_25 = arith.constant -1.000000e+30 : f32
    %63 = vector.broadcast %cst_25 : f32 to vector<64x16xf32>
    %64 = arith.select %62, %27, %63 : vector<64x16xi1>, vector<64x16xf32>
    %cst_26 = arith.constant dense<0xFF800000> : vector<64xf32>
    %65 = vector.multi_reduction <maximumf>, %64, %cst_26 [1] : vector<64x16xf32> to vector<64xf32>
    %66 = vector.shape_cast %65 : vector<64xf32> to vector<64x1xf32>
    %67 = vector.broadcast %66 : vector<64x1xf32> to vector<64x16xf32>
    %68 = arith.subf %64, %67 : vector<64x16xf32>
    %69 = math.exp %68 : vector<64x16xf32>
    %cst_27 = arith.constant dense<0.000000e+00> : vector<64xf32>
    %70 = vector.multi_reduction <add>, %69, %cst_27 [1] : vector<64x16xf32> to vector<64xf32>
    %71 = vector.shape_cast %70 : vector<64xf32> to vector<64x1xf32>
    %72 = tpu.reciprocal %71 {approx = true} : vector<64x1xf32> -> vector<64x1xf32>
    %73 = vector.broadcast %72 : vector<64x1xf32> to vector<64x16xf32>
    %74 = arith.mulf %69, %73 : vector<64x16xf32>
    %75 = vector.extract_strided_slice %74 {offsets = [0, 0], sizes = [16, 16], strides = [1, 1]} : vector<64x16xf32> to vector<16x16xf32>
    %76 = vector.extract_strided_slice %12 {offsets = [0, 0], sizes = [16, 8], strides = [1, 1]} : vector<16x32xf32> to vector<16x8xf32>
    %cst_28 = arith.constant dense<0.000000e+00> : vector<16x8xf32>
    %77 = tpu.matmul %75, %76, %cst_28 {dimension_numbers = #tpu.dot_dimension_numbers<[1], [0], [0], [1], [0, 0, 1, 1], [], []>} : vector<16x16xf32>, vector<16x8xf32>, vector<16x8xf32> -> vector<16x8xf32>
    %78 = vector.extract_strided_slice %74 {offsets = [16, 0], sizes = [16, 16], strides = [1, 1]} : vector<64x16xf32> to vector<16x16xf32>
    %79 = vector.extract_strided_slice %12 {offsets = [0, 8], sizes = [16, 8], strides = [1, 1]} : vector<16x32xf32> to vector<16x8xf32>
    %cst_29 = arith.constant dense<0.000000e+00> : vector<16x8xf32>
    %80 = tpu.matmul %78, %79, %cst_29 {dimension_numbers = #tpu.dot_dimension_numbers<[1], [0], [0], [1], [0, 0, 1, 1], [], []>} : vector<16x16xf32>, vector<16x8xf32>, vector<16x8xf32> -> vector<16x8xf32>
    %81 = vector.extract_strided_slice %74 {offsets = [32, 0], sizes = [16, 16], strides = [1, 1]} : vector<64x16xf32> to vector<16x16xf32>
    %82 = vector.extract_strided_slice %12 {offsets = [0, 16], sizes = [16, 8], strides = [1, 1]} : vector<16x32xf32> to vector<16x8xf32>
    %cst_30 = arith.constant dense<0.000000e+00> : vector<16x8xf32>
    %83 = tpu.matmul %81, %82, %cst_30 {dimension_numbers = #tpu.dot_dimension_numbers<[1], [0], [0], [1], [0, 0, 1, 1], [], []>} : vector<16x16xf32>, vector<16x8xf32>, vector<16x8xf32> -> vector<16x8xf32>
    %84 = vector.extract_strided_slice %74 {offsets = [48, 0], sizes = [16, 16], strides = [1, 1]} : vector<64x16xf32> to vector<16x16xf32>
    %85 = vector.extract_strided_slice %12 {offsets = [0, 24], sizes = [16, 8], strides = [1, 1]} : vector<16x32xf32> to vector<16x8xf32>
    %cst_31 = arith.constant dense<0.000000e+00> : vector<16x8xf32>
    %86 = tpu.matmul %84, %85, %cst_31 {dimension_numbers = #tpu.dot_dimension_numbers<[1], [0], [0], [1], [0, 0, 1, 1], [], []>} : vector<16x16xf32>, vector<16x8xf32>, vector<16x8xf32> -> vector<16x8xf32>
    %87 = tpu.concatenate %77, %80, %83, %86 in 1 : vector<16x8xf32>, vector<16x8xf32>, vector<16x8xf32>, vector<16x8xf32> -> vector<16x32xf32>
    %c0_32 = arith.constant 0 : index
    %c0_33 = arith.constant 0 : index
    %88 = vector.load %arg6[%c0_32, %c0_33] : memref<32x32xf32, #tpu.memory_space<vmem>>, vector<32x32xf32>
    %cst_34 = arith.constant dense<0.000000e+00> : vector<16x32xf32>
    %89 = tpu.matmul %87, %88, %cst_34 {dimension_numbers = #tpu.dot_dimension_numbers<[1], [0], [0], [1], [0, 0, 1, 1], [], []>} : vector<16x32xf32>, vector<32x32xf32>, vector<16x32xf32> -> vector<16x32xf32>
    %c0_35 = arith.constant 0 : index
    %c0_36 = arith.constant 0 : index
    %90 = vector.load %arg7[%c0_35, %c0_36] : memref<1x32xf32, #tpu.memory_space<vmem>>, vector<1x32xf32>
    %91 = vector.broadcast %90 : vector<1x32xf32> to vector<16x32xf32>
    %92 = arith.addf %89, %91 : vector<16x32xf32>
    %93 = arith.addf %0, %92 : vector<16x32xf32>
    %cst_37 = arith.constant dense<0.000000e+00> : vector<16xf32>
    %94 = vector.multi_reduction <add>, %93, %cst_37 [1] : vector<16x32xf32> to vector<16xf32>
    %95 = vector.shape_cast %94 : vector<16xf32> to vector<16x1xf32>
    %cst_38 = arith.constant 3.200000e+01 : f32
    %96 = vector.broadcast %cst_38 : f32 to vector<16x1xf32>
    %97 = arith.divf %95, %96 : vector<16x1xf32>
    %98 = vector.broadcast %97 : vector<16x1xf32> to vector<16x32xf32>
    %99 = arith.subf %93, %98 : vector<16x32xf32>
    %100 = arith.mulf %99, %99 : vector<16x32xf32>
    %cst_39 = arith.constant dense<0.000000e+00> : vector<16xf32>
    %101 = vector.multi_reduction <add>, %100, %cst_39 [1] : vector<16x32xf32> to vector<16xf32>
    %102 = vector.shape_cast %101 : vector<16xf32> to vector<16x1xf32>
    %cst_40 = arith.constant 3.200000e+01 : f32
    %103 = vector.broadcast %cst_40 : f32 to vector<16x1xf32>
    %104 = arith.divf %102, %103 : vector<16x1xf32>
    %cst_41 = arith.constant 9.99999974E-6 : f32
    %105 = vector.broadcast %cst_41 : f32 to vector<16x1xf32>
    %106 = arith.addf %104, %105 : vector<16x1xf32>
    %107 = math.rsqrt %106 : vector<16x1xf32>
    %108 = vector.broadcast %107 : vector<16x1xf32> to vector<16x32xf32>
    %109 = arith.mulf %99, %108 : vector<16x32xf32>
    %c0_42 = arith.constant 0 : index
    %c0_43 = arith.constant 0 : index
    %110 = vector.load %arg8[%c0_42, %c0_43] : memref<1x32xf32, #tpu.memory_space<vmem>>, vector<1x32xf32>
    %111 = vector.broadcast %110 : vector<1x32xf32> to vector<16x32xf32>
    %112 = arith.mulf %109, %111 : vector<16x32xf32>
    %c0_44 = arith.constant 0 : index
    %c0_45 = arith.constant 0 : index
    %113 = vector.load %arg9[%c0_44, %c0_45] : memref<1x32xf32, #tpu.memory_space<vmem>>, vector<1x32xf32>
    %114 = vector.broadcast %113 : vector<1x32xf32> to vector<16x32xf32>
    %115 = arith.addf %112, %114 : vector<16x32xf32>
    %c0_46 = arith.constant 0 : index
    %c0_47 = arith.constant 0 : index
    %116 = vector.load %arg10[%c0_46, %c0_47] : memref<16x32xf32, #tpu.memory_space<vmem>>, vector<16x32xf32>
    tpu.vector_store %arg10[%c0_46, %c0_47], %115 {strides = array<i32>} : memref<16x32xf32, #tpu.memory_space<vmem>>, vector<16x32xf32>,
    return
  }
}

</mosaic_0001>

<bundles_post_ra>
// kernel: tpu_custom_call.1
= control target key start
LH: loop header
LB: loop body
LE: loop exit
PB: predicated region body
PF: predicated region fallthrough
CT: control target
= control target key end

     0   :  { %15 = vsyncpa [#allocation3], 0  ;;  %s1377_s0 = inlined_call_operand.hbm [shape: f32[16,32], index: 0, kind: input, shape index: {}]   ;;  %s1378_s1 = inlined_call_operand.hbm [shape: f32[16,32], index: 1, kind: input, shape index: {}]   ;;  %s1379_s2 = inlined_call_operand.hbm [shape: f32[32,64], index: 2, kind: input, shape index: {}]   ;;  %s1380_s3 = inlined_call_operand.hbm [shape: f32[32,32], index: 3, kind: input, shape index: {}]   ;;  %s1381_s4 = inlined_call_operand.vmem [shape: f32[1,64], index: 4, kind: input, shape index: {}]   ;;  %s1382_s5 = inlined_call_operand.vmem [shape: f32[1,32], index: 5, kind: input, shape index: {}]   ;;  %s1383_s6 = inlined_call_operand.hbm [shape: f32[32,32], index: 6, kind: input, shape index: {}]   ;;  %s1384_s7 = inlined_call_operand.vmem [shape: f32[1,32], index: 7, kind: input, shape index: {}]   ;;  %s1385_s8 = inlined_call_operand.vmem [shape: f32[1,32], index: 8, kind: input, shape index: {}]   ;;  %s1386_s9 = inlined_call_operand.vmem [shape: f32[1,32], index: 9, kind: input, shape index: {}]   ;;  %s1387_s10 = inlined_call_operand.hbm [shape: f32[16,32], index: 10, kind: output, shape index: {}]  }
   0x1   :  { %16 = vsyncpa [#allocation6], 0 }
   0x2   :  { %17 = vsyncpa [#allocation9], 0 }
   0x3   :  { %18 = vsyncpa [#allocation4], 0  ;;  %s36_s15 = sshll.u32 %s1378_s1, 4  ;;  %s1128_s16 = smov [#allocation5]   ;;  %s37_s15 = int_to_ptr.hbm [resolvable:$true] %s36_s15 }
   0x4   :  { %s38_s17 = sshll.u32 %s1128_s16, 4  ;;  %s62_s20 = sshll.u32 %s1380_s3, 4  ;;  %s39_s17 = int_to_ptr.vmem [resolvable:$true] %s38_s17  ;;  %s63_s20 = int_to_ptr.hbm [resolvable:$true] %s62_s20 }
   0x5   :  { %s1129_s21 = smov 128   ;;  %s1130_s22 = smov 8  }
   0x6   :  { %44 = dma.hbm_to_vmem [thread:$0]  %s37_s15, 256, %s39_s17, [#allocation6], %s1129_s21, %s1129_s21, %s1130_s22  }
   0x7   :  { %s1131_s23 = smov [#allocation8]   ;;  %s23_s1 = sshll.u32 %s1377_s0, 4  ;;  %s24_s1 = int_to_ptr.hbm [resolvable:$true] %s23_s1 }
   0x8   :  { %s64_s24 = sshll.u32 %s1131_s23, 4  ;;  %s49_s28 = sshll.u32 %s1379_s2, 4  ;;  %s65_s24 = int_to_ptr.vmem [resolvable:$true] %s64_s24  ;;  %s50_s28 = int_to_ptr.hbm [resolvable:$true] %s49_s28 }
   0x9   :  { %70 = dma.hbm_to_vmem [thread:$0]  %s63_s20, 512, %s65_s24, [#allocation9], %s1129_s21, %s1129_s21, %s1130_s22  }
   0xa   :  { %s1132_s29 = smov [#allocation2]   ;;  %s1133_s11 = smov [#allocation7]  }
   0xb   :  { %s25_s30 = sshll.u32 %s1132_s29, 4  ;;  %s51_s0 = sshll.u32 %s1133_s11, 4  ;;  %s26_s30 = int_to_ptr.vmem [resolvable:$true] %s25_s30  ;;  %s52_s0 = int_to_ptr.vmem [resolvable:$true] %s51_s0 }
   0xc   :  { %31 = dma.hbm_to_vmem [thread:$0]  %s24_s1, 256, %s26_s30, [#allocation3], %s1129_s21, %s1129_s21, %s1130_s22  }
   0xd   :  { %s79_s14 = sshll.u32 %s1383_s6, 4  ;;  %s1134_s2 = smov [#allocation10]   ;;  %s80_s14 = int_to_ptr.hbm [resolvable:$true] %s79_s14 }
   0xe   :  { %57 = dma.hbm_to_vmem [thread:$0]  %s50_s28, 512, %s52_s0, [#allocation6], %s1129_s21, %s1129_s21, %s1130_s22  }
   0xf   :  { %s81_s15 = sshll.u32 %s1134_s2, 4  ;;  %s82_s15 = int_to_ptr.vmem [resolvable:$true] %s81_s15 }
  0x10   :  { %87 = dma.hbm_to_vmem [thread:$0]  %s80_s14, 512, %s82_s15, [#allocation9], %s1129_s21, %s1129_s21, %s1130_s22  }
  0x11   :  { %1120 = dma.done.wait [#allocation3], 256  }
  0x12   :  { %1121 = vsyncadd [#allocation3], 4294967040 }
  0x13   :  { %1122 = dma.done.wait [#allocation6], 768  }
  0x14   :  { %1123 = vsyncadd [#allocation6], 4294966528 }
  0x15   :  { %1124 = dma.done.wait [#allocation9], 1024  }
  0x16   :  { %1125 = vsyncadd [#allocation9], 4294966272  ;;  %v123_v0 = vld [vmem:[#allocation7 + $0x18] sm:$0xff]  ;;  %v122_v1 = vld [vmem:[#allocation7 + $0x10] sm:$0xff]  ;;  %vm128_vm0 = vcmask 261120   ;;  %s1135_s17 = smov 120   ;;  %v350_v38 = vlaneseq }
  0x17   :  { %147 = vmatpush.msra.mxu0 %v123_v0  ;;  %896 = vmatpush.msra.mxu3 %v123_v0  ;;  %v121_v2 = vld [vmem:[#allocation7 + $0x8] sm:$0xff]  ;;  %v1231_v3 = vld [vmem:[#allocation2] sm:$0xff]  ;;  %v116_v4 = vld [vmem:[#allocation5] sm:$0xff]  ;;  %s1136_s18 = smov 72   ;;  %s1137_s19 = smov 88   ;;  %vm201_vm1 = vcmask 64512  }
  0x18   :  { %v1233_v5 = vld [vmem:[#allocation2 + $0x8] sm:$0xff]  ;;  %v117_v6 = vld [vmem:[#allocation5 + $0x8] sm:$0xff]  ;;  %v120_v7 = vld [vmem:[#allocation7] sm:$0xff]  ;;  %v118_v8 = vadd.f32 %v116_v4, %v1231_v3  ;;  %s1139_s20 = smov 112   ;;  %s1140_s23 = smov 104   ;;  %v351_v39 = vshrl.u32 %v350_v38, 7 }
  0x19   :  { %148 = vmatpush.msra.mxu0 %v122_v1  ;;  %897 = vmatpush.msra.mxu3 %v122_v1  ;;  %v119_v9 = vadd.f32 %v117_v6, %v1233_v5  ;;  %v933_v10 = vld [vmem:[%s1381_s4] ss:$0 sm:$0xff]  ;;  %v161_v15 = vld [vmem:[#allocation8 + $0x18] sm:$0xff]  ;;  %v160_v16 = vld [vmem:[#allocation8 + $0x10] sm:$0xff]  ;;  %s1138_s4 = smov 80   ;;  %s1141_s24 = smov 96  }
  0x1a   :  { %184 = vmatpush.msra.mxu1 %v161_v15  ;;  %v159_v17 = vld [vmem:[#allocation8 + $0x8] sm:$0xff]  ;;  %v158_v18 = vld [vmem:[#allocation8] sm:$0xff]  ;;  %v355_v40 = vadd.s32 32, %v351_v39  ;;  %v360_v41 = vand.u32 127, %v350_v38  ;;  %v357_v43 = vadd.s32 48, %v351_v39  ;;  %v353_v47 = vadd.s32 16, %v351_v39 }
  0x1b   :  { %149 = vmatpush.msra.mxu0 %v121_v2  ;;  %898 = vmatpush.msra.mxu3 %v121_v2  ;;  %v934_v31 = vld [vmem:[%s1382_s5] ss:$0 sm:$0xff]  ;;  %vm485_vm3 = vcmask 130048   ;;  %v358_v50 = vadd.s32 56, %v351_v39  ;;  %v356_v57 = vadd.s32 40, %v351_v39  ;;  %v365_v2 = vand.u32 1, %v351_v39 }
  0x1c   :  { %185 = vmatpush.msra.mxu1 %v160_v16  ;;  %v393_v42 = vand.u32 1, %v355_v40  ;;  %v461_v44 = vand.u32 1, %v360_v41  ;;  %v407_v45 = vand.u32 1, %v357_v43  ;;  %v379_v51 = vand.u32 1, %v353_v47  ;;  %s1142_s5 = smov 24   ;;  %s1143_s1 = smov 16  }
  0x1d   :  { %150 = vmatpush.msra.mxu0 %v120_v7  ;;  %899 = vmatpush.msra.mxu3 %v120_v7  ;;  %v414_v55 = vand.u32 1, %v358_v50  ;;  %v400_v59 = vand.u32 1, %v356_v57  ;;  %v354_v4 = vadd.s32 24, %v351_v39  ;;  %v352_v7 = vadd.s32 8, %v351_v39  ;;  %s851_s13 = sshll.u32 %s1387_s10, 4  ;;  %s852_s13 = int_to_ptr.hbm [resolvable:$true] %s851_s13 }
  0x1e   :  { %866 = vmatmul.msk.f32.vlgmr.msra.gmra.mxu0 %vm128_vm0, %v118_v8  ;;  %867 = vmatmul.msk.f32.vlgmr.msra.gmra.mxu3 %vm128_vm0, %v119_v9  ;;  %vm473_vm2 = vcmp.eq.s32.totalorder %v393_v42, %v461_v44  ;;  %vm475_vm4 = vcmp.eq.s32.totalorder %v407_v45, %v461_v44  ;;  %vm471_vm5 = vcmp.eq.s32.totalorder %v379_v51, %v461_v44  ;;  %vm738_vm11 = vcmask 195584  }
  0x1f   :  { %186 = vmatpush.msra.mxu1 %v159_v17  ;;  %vm476_vm6 = vcmp.eq.s32.totalorder %v414_v55, %v461_v44  ;;  %vm474_vm7 = vcmp.eq.s32.totalorder %v400_v59, %v461_v44  ;;  %vm469_vm8 = vcmp.eq.s32.totalorder %v365_v2, %v461_v44  ;;  %v386_v8 = vand.u32 1, %v354_v4 }
  0x21   :  { %187 = vmatpush.msra.mxu1 %v158_v18  ;;  %vm472_vm9 = vcmp.eq.s32.totalorder %v386_v8, %v461_v44 }
  0x22   :  { %868 = vmatmul.msk.f32.vlgmr.msra.gmra.mxu1 %vm128_vm0, %v1231_v3 }
  0x2a   :  { %869 = vmatmul.msk.f32.gmra.mxu1 %vm128_vm0, %v1233_v5 }
  0x9b   :  { %v152_v11 = vpop.f32.mrf.mxu0 }
  0x9c   :  { %v1242_v12 = vadd.f32 %v933_v10, %v152_v11 }
  0x9e   :  { %233 = vrot.lane.b32.xlu1 %v1242_v12, %s1135_s17 }
  0x9f   :  { %v189_v28 = vpop.f32.mrf.mxu1 }
  0xa0   :  { %v1289_v37 = vadd.f32 %v934_v31, %v189_v28 }
  0xa1   :  { %v155_v13 = vpop.f32.mrf.mxu3 }
  0xa2   :  { %v1246_v14 = vadd.f32 %v933_v10, %v155_v13 }
  0xa4   :  { %317 = vrot.lane.b32.xlu2 %v1246_v14, %s1136_s18  ;;  %239 = vrot.lane.b32.xlu0 %v1246_v14, %s1137_s19 }
  0xa6   :  { %278 = vrot.lane.b32.xlu1 %v1246_v14, %s1138_s4 }
  0xa7   :  { %v192_v32 = vpop.f32.mrf.mxu1 }
  0xa8   :  { %v1286_v35 = vadd.f32 %v934_v31, %v192_v32 }
  0xac   :  { %235 = vrot.lane.b32.xlu2 %v1246_v14, %s1135_s17  ;;  %237 = vrot.lane.b32.xlu0 %v1242_v12, %s1137_s19 }
  0xae   :  { %315 = vrot.lane.b32.xlu1 %v1242_v12, %s1136_s18 }
  0xb4   :  { %272 = vrot.lane.b32.xlu2 %v1242_v12, %s1139_s20  ;;  %276 = vrot.lane.b32.xlu0 %v1242_v12, %s1138_s4 }
  0xb6   :  { %274 = vrot.lane.b32.xlu1 %v1246_v14, %s1139_s20 }
  0xbc   :  { %313 = vrot.lane.b32.xlu2 %v1246_v14, %s1140_s23  ;;  %311 = vrot.lane.b32.xlu0 %v1242_v12, %s1140_s23 }
  0xbe   :  { %197 = vrot.lane.b32.xlu1 %v1242_v12, %s1141_s24 }
  0xc4   :  { %199 = vrot.lane.b32.xlu0 %v1246_v14, %s1141_s24 }
  0xfe   :  { %v318_v19 = vpop.permute.xlu2 %317 }
  0xff   :  { %882 = vmatpush.xpose.msk.msrb.mxu1 %vm201_vm1, %v318_v19  ;;  %v918_v19 = vpack.i.bf16 %v1289_v37, %v1286_v35 }
 0x106   :  { %v236_v24 = vpop.permute.xlu2 %235 }
 0x10e   :  { %v273_v27 = vpop.permute.xlu2 %272 }
 0x110   :  { %v234_v20 = vpop.permute.xlu1 %233 }
 0x116   :  { %v240_v21 = vpop.permute.xlu0 %239  ;;  %v314_v33 = vpop.permute.xlu2 %313 }
 0x117   :  { %874 = vmatpush.xpose.msk.msrb.mxu3 %vm201_vm1, %v240_v21 }
 0x118   :  { %v279_v22 = vpop.permute.xlu1 %278 }
 0x119   :  { %878 = vmatpush.xpose.msk.msrb.mxu0 %vm201_vm1, %v279_v22 }
 0x11e   :  { %v238_v23 = vpop.permute.xlu0 %237 }
 0x11f   :  { %875 = vmatpush.xpose.msk.msrb.mxu3 %vm201_vm1, %v238_v23 }
 0x120   :  { %v316_v25 = vpop.permute.xlu1 %315 }
 0x121   :  { %883 = vmatpush.xpose.msk.msrb.mxu1 %vm201_vm1, %v316_v25 }
 0x122   :  { %876 = vmatmul.msk.f32.vlgmr.msrb.gmra.mxu3 %vm201_vm1, %v234_v20 }
 0x126   :  { %v277_v26 = vpop.permute.xlu0 %276 }
 0x127   :  { %879 = vmatpush.xpose.msk.msrb.mxu0 %vm201_vm1, %v277_v26 }
 0x128   :  { %v275_v30 = vpop.permute.xlu1 %274 }
 0x12a   :  { %877 = vmatmul.msk.f32.gmra.mxu3 %vm201_vm1, %v236_v24  ;;  %880 = vmatmul.msk.f32.vlgmr.msrb.gmra.mxu0 %vm201_vm1, %v273_v27 }
 0x12e   :  { %v312_v29 = vpop.permute.xlu0 %311 }
 0x12f   :  { %884 = vmatmul.msk.f32.vlgmr.msrb.gmra.mxu1 %vm201_vm1, %v312_v29 }
 0x130   :  { %v198_v36 = vpop.permute.xlu1 %197 }
 0x132   :  { %881 = vmatmul.msk.f32.gmra.mxu0 %vm201_vm1, %v275_v30 }
 0x136   :  { %v200_v34 = vpop.permute.xlu0 %199 }
 0x137   :  { %870 = vmatpush.xpose.msk.msra.mxu2 %vm201_vm1, %v200_v34  ;;  %885 = vmatmul.msk.f32.gmra.mxu1 %vm201_vm1, %v314_v33 }
 0x13b   :  { %871 = vmatpush.xpose.msk.msra.mxu2 %vm201_vm1, %v198_v36 }
 0x13e   :  { %872 = vmatmul.msk.f32.vlgmr.msra.gmra.mxu2 %vm201_vm1, %v1242_v12  ;;  %v372_v12 = vand.u32 1, %v352_v7 }
 0x13f   :  { %594 = vmatpush.msrb.mxu2 %v1286_v35 }
 0x140   :  { %vm470_vm10 = vcmp.eq.s32.totalorder %v372_v12, %v461_v44 }
 0x141   :  { %595 = vmatpush.msrb.mxu2 %v1289_v37 }
 0x146   :  { %873 = vmatmul.msk.f32.gmra.mxu2 %vm201_vm1, %v1246_v14 }
 0x1a5   :  { %v266_v56 = vpop.f32.mrf.mxu3 }
 0x1a6   :  { %v479_v58 = vsel %vm471_vm5, %v266_v56, -1e+30 }
 0x1a7   :  { %v305_v46 = vpop.f32.mrf.mxu0  ;;  %v492_v62 = vsel %vm485_vm3, %v479_v58, -inf }
 0x1a8   :  { %v481_v48 = vsel %vm473_vm2, %v305_v46, -1e+30 }
 0x1a9   :  { %v498_v49 = vsel %vm485_vm3, %v481_v48, -inf }
 0x1aa   :  { %499 = vmax.xlane.f32.xlu0 %v498_v49 }
 0x1ac   :  { %v344_v52 = vpop.f32.mrf.mxu1 }
 0x1ad   :  { %v483_v53 = vsel %vm475_vm4, %v344_v52, -1e+30  ;;  %v269_v13 = vpop.f32.mrf.mxu3 }
 0x1ae   :  { %v504_v54 = vsel %vm485_vm3, %v483_v53, -inf  ;;  %v480_v14 = vsel %vm472_vm9, %v269_v13, -1e+30 }
 0x1af   :  { %505 = vmax.xlane.f32.xlu2 %v504_v54  ;;  %v308_v0 = vpop.f32.mrf.mxu0  ;;  %v495_v17 = vsel %vm485_vm3, %v480_v14, -inf }
 0x1b0   :  { %v482_v1 = vsel %vm474_vm7, %v308_v0, -1e+30 }
 0x1b1   :  { %v501_v6 = vsel %vm485_vm3, %v482_v1, -inf }
 0x1b4   :  { %v347_v60 = vpop.f32.mrf.mxu1 }
 0x1b5   :  { %v484_v61 = vsel %vm476_vm6, %v347_v60, -1e+30 }
 0x1b6   :  { %v507_v63 = vsel %vm485_vm3, %v484_v61, -inf }
 0x1b7   :  { %493 = vmax.xlane.f32.xlu2 %v492_v62  ;;  %508 = vmax.xlane.f32.xlu0 %v507_v63 }
 0x1bf   :  { %502 = vmax.xlane.f32.xlu2 %v501_v6 }
 0x1c1   :  { %v227_v9 = vpop.f32.mrf.mxu2 }
 0x1c2   :  { %v1302_v10 = vsel %vm469_vm8, %v227_v9, -1e+30 }
 0x1c3   :  { %v486_v11 = vsel %vm485_vm3, %v1302_v10, -inf }
 0x1c4   :  { %487 = vmax.xlane.f32.xlu1 %v486_v11 }
 0x1c9   :  { %v230_v15 = vpop.f32.mrf.mxu2 }
 0x1ca   :  { %v478_v16 = vsel %vm470_vm10, %v230_v15, -1e+30 }
 0x1cb   :  { %v489_v18 = vsel %vm485_vm3, %v478_v16, -inf }
 0x1cc   :  { %496 = vmax.xlane.f32.xlu1 %v495_v17  ;;  %490 = vmax.xlane.f32.xlu2 %v489_v18 }
 0x1e4   :  { %919 = vrot.lane.b32.xlu2 %v918_v19, %s1135_s17 }
 0x21d   :  { %v500_v20 = vpop.xlane.xlu0 %499 }
 0x21e   :  { %v514_v21 = vsub.f32 %v481_v48, %v500_v20 }
 0x220   :  { %v526_v22 = vmul.f32 1.442695, %v514_v21 }
 0x222   :  { %938 = vpow2.f32 %v526_v22  ;;  %v506_v23 = vpop.xlane.xlu2 %505 }
 0x223   :  { %v516_v24 = vsub.f32 %v483_v53, %v506_v23 }
 0x225   :  { %v530_v25 = vmul.f32 1.442695, %v516_v24 }
 0x227   :  { %940 = vpow2.f32 %v530_v25 }
 0x228   :  { %v1311_v26 = vpop.eup %938 }
 0x229   :  { %v546_v27 = vsel %vm485_vm3, %v1311_v26, 0.0 }
 0x22a   :  { %v494_v28 = vpop.xlane.xlu2 %493  ;;  %547 = vadd.xlane.f32.xlu1 %v546_v27  ;;  %v509_v29 = vpop.xlane.xlu0 %508 }
 0x22b   :  { %v512_v30 = vsub.f32 %v479_v58, %v494_v28  ;;  %v517_v31 = vsub.f32 %v484_v61, %v509_v29 }
 0x22d   :  { %v522_v32 = vmul.f32 1.442695, %v512_v30  ;;  %v532_v33 = vmul.f32 1.442695, %v517_v31  ;;  %v1315_v34 = vpop.eup %940 }
 0x22e   :  { %v552_v35 = vsel %vm485_vm3, %v1315_v34, 0.0 }
 0x22f   :  { %942 = vpow2.f32 %v522_v32 }
 0x230   :  { %944 = vpow2.f32 %v532_v33 }
 0x232   :  { %v503_v36 = vpop.xlane.xlu2 %502  ;;  %553 = vadd.xlane.f32.xlu1 %v552_v35 }
 0x233   :  { %v515_v37 = vsub.f32 %v482_v1, %v503_v36 }
 0x235   :  { %v943_v38 = vpop.eup %942  ;;  %v528_v39 = vmul.f32 1.442695, %v515_v37  ;;  %v744_v37 = vld [vmem:[#allocation10 + $0x18] sm:$0xff] }
 0x236   :  { %v1319_v40 = vpop.eup %944  ;;  %v540_v41 = vsel %vm485_vm3, %v943_v38, 0.0  ;;  %767 = vmatpush.msra.mxu2 %v744_v37 }
 0x237   :  { %946 = vpow2.f32 %v528_v39  ;;  %541 = vadd.xlane.f32.xlu0 %v540_v41  ;;  %v488_v42 = vpop.xlane.xlu1 %487  ;;  %v555_v43 = vsel %vm485_vm3, %v1319_v40, 0.0  ;;  %v742_v39 = vld [vmem:[#allocation10 + $0x8] sm:$0xff] }
 0x238   :  { %556 = vadd.xlane.f32.xlu2 %v555_v43  ;;  %v510_v57 = vsub.f32 %v1302_v10, %v488_v42 }
 0x23a   :  { %v518_v58 = vmul.f32 1.442695, %v510_v57 }
 0x23d   :  { %v1324_v44 = vpop.eup %946 }
 0x23e   :  { %v549_v45 = vsel %vm485_vm3, %v1324_v44, 0.0 }
 0x23f   :  { %v497_v46 = vpop.xlane.xlu1 %496  ;;  %v491_v47 = vpop.xlane.xlu2 %490  ;;  %550 = vadd.xlane.f32.xlu1 %v549_v45 }
 0x240   :  { %v513_v48 = vsub.f32 %v480_v14, %v497_v46  ;;  %v511_v55 = vsub.f32 %v478_v16, %v491_v47 }
 0x242   :  { %v524_v49 = vmul.f32 1.442695, %v513_v48  ;;  %v520_v56 = vmul.f32 1.442695, %v511_v55  ;;  %v935_v55 = vld [vmem:[%s1384_s7] ss:$0 sm:$0xff] }
 0x244   :  { %948 = vpow2.f32 %v524_v49 }
 0x245   :  { %950 = vpow2.f32 %v520_v56 }
 0x246   :  { %952 = vpow2.f32 %v518_v58 }
 0x247   :  { %v920_v50 = vpop.permute.xlu2 %919 }
 0x248   :  { %v921_v51 = vunpack.i.l.bf16 %v920_v50  ;;  %v922_v53 = vunpack.i.h.bf16 %v920_v50 }
 0x24a   :  { %v949_v52 = vpop.eup %948  ;;  %631 = vmatpush.msra.mxu3 %v921_v51 }
 0x24b   :  { %v543_v54 = vsel %vm485_vm3, %v949_v52, 0.0  ;;  %v951_v59 = vpop.eup %950 }
 0x24c   :  { %544 = vadd.xlane.f32.xlu0 %v543_v54  ;;  %632 = vmatpush.msra.mxu3 %v922_v53  ;;  %v537_v60 = vsel %vm485_vm3, %v951_v59, 0.0  ;;  %v953_v61 = vpop.eup %952 }
 0x24d   :  { %v534_v62 = vsel %vm485_vm3, %v953_v61, 0.0 }
 0x258   :  { %929 = vrot.lane.b32.xlu1 %v918_v19, %s1140_s23 }
 0x260   :  { %924 = vrot.lane.b32.xlu0 %v918_v19, %s1139_s20 }
 0x282   :  { %538 = vadd.xlane.f32.xlu1 %v537_v60 }
 0x28a   :  { %535 = vadd.xlane.f32.xlu0 %v534_v62 }
 0x29d   :  { %v548_v0 = vpop.xlane.xlu1 %547 }
 0x2a5   :  { %v554_v4 = vpop.xlane.xlu1 %553 }
 0x2aa   :  { %v542_v63 = vpop.xlane.xlu0 %541 }
 0x2ab   :  { %954 = vrcp.f32 %v542_v63  ;;  %v557_v10 = vpop.xlane.xlu2 %556 }
 0x2b1   :  { %v955_v1 = vpop.eup %954 }
 0x2b2   :  { %v568_v2 = vmul.f32 %v955_v1, %v943_v38  ;;  %v551_v7 = vpop.xlane.xlu1 %550  ;;  %v743_v38 = vld [vmem:[#allocation10 + $0x10] sm:$0xff] }
 0x2b3   :  { %768 = vmatpush.msra.mxu2 %v743_v38 }
 0x2b4   :  { %888 = vmatmul.msk.f32.vlgmr.msra.gmra.mxu3 %vm485_vm3, %v568_v2 }
 0x2b5   :  { %769 = vmatpush.msra.mxu2 %v742_v39 }
 0x2bf   :  { %v545_v6 = vpop.xlane.xlu0 %544 }
 0x2c0   :  { %956 = vrcp.f32 %v545_v6 }
 0x2c1   :  { %958 = vrcp.f32 %v554_v4 }
 0x2c2   :  { %960 = vrcp.f32 %v548_v0  ;;  %v1144_v0 = vmov 32.0  }
 0x2c3   :  { %962 = vrcp.f32 %v557_v10 }
 0x2c4   :  { %964 = vrcp.f32 %v551_v7 }
 0x2c6   :  { %v957_v8 = vpop.eup %956 }
 0x2c7   :  { %v569_v9 = vmul.f32 %v957_v8, %v949_v52  ;;  %v959_v12 = vpop.eup %958 }
 0x2c8   :  { %v572_v15 = vmul.f32 %v959_v12, %v1315_v34  ;;  %v961_v16 = vpop.eup %960 }
 0x2c9   :  { %889 = vmatmul.msk.f32.gmra.mxu3 %vm485_vm3, %v569_v9  ;;  %v963_v18 = vpop.eup %962  ;;  %v570_v21 = vmul.f32 %v961_v16, %v1311_v26 }
 0x2ca   :  { %v930_v11 = vpop.permute.xlu1 %929  ;;  %v573_v22 = vmul.f32 %v963_v18, %v1319_v40  ;;  %v965_v23 = vpop.eup %964  ;;  %v741_v40 = vld [vmem:[#allocation10] sm:$0xff] }
 0x2cb   :  { %v931_v13 = vunpack.i.l.bf16 %v930_v11  ;;  %v932_v14 = vunpack.i.h.bf16 %v930_v11  ;;  %v571_v24 = vmul.f32 %v965_v23, %v1324_v44  ;;  %770 = vmatpush.msra.mxu2 %v741_v40 }
 0x2cd   :  { %701 = vmatpush.msra.mxu1 %v931_v13 }
 0x2cf   :  { %702 = vmatpush.msra.mxu1 %v932_v14 }
 0x2d0   :  { %892 = vmatmul.msk.f32.vlgmr.msra.gmra.mxu1 %vm485_vm3, %v572_v15 }
 0x2d2   :  { %v925_v17 = vpop.permute.xlu0 %924 }
 0x2d3   :  { %v926_v19 = vunpack.i.l.bf16 %v925_v17  ;;  %v927_v20 = vunpack.i.h.bf16 %v925_v17 }
 0x2d5   :  { %666 = vmatpush.msra.mxu0 %v926_v19 }
 0x2d7   :  { %667 = vmatpush.msra.mxu0 %v927_v20 }
 0x2d8   :  { %890 = vmatmul.msk.f32.vlgmr.msra.gmra.mxu0 %vm485_vm3, %v570_v21  ;;  %893 = vmatmul.msk.f32.gmra.mxu1 %vm485_vm3, %v573_v22 }
 0x2e0   :  { %891 = vmatmul.msk.f32.gmra.mxu0 %vm485_vm3, %v571_v24 }
 0x2f5   :  { %v539_v27 = vpop.xlane.xlu1 %538 }
 0x2fd   :  { %v536_v25 = vpop.xlane.xlu0 %535 }
 0x2fe   :  { %966 = vrcp.f32 %v536_v25 }
 0x2ff   :  { %968 = vrcp.f32 %v539_v27 }
 0x300   :  { %970 = vrcp.f32 %v1144_v0 }
 0x304   :  { %v967_v28 = vpop.eup %966 }
 0x305   :  { %v566_v29 = vmul.f32 %v967_v28, %v953_v61  ;;  %v969_v26 = vpop.eup %968 }
 0x306   :  { %v567_v30 = vmul.f32 %v969_v26, %v951_v59  ;;  %v971_v1 = vpop.eup %970 }
 0x307   :  { %886 = vmatmul.msk.f32.vlgmr.msrb.gmra.mxu2 %vm485_vm3, %v566_v29  ;;  %v787_v2 = vmul.f32 32.0, %v971_v1  ;;  %vm791_vm12 = vweird.f32 %v971_v1 }
 0x309   :  { %v788_v4 = vsub.f32 1.0, %v787_v2 }
 0x30b   :  { %v789_v6 = vmul.f32 %v971_v1, %v788_v4 }
 0x30d   :  { %v790_v7 = vadd.f32 %v971_v1, %v789_v6 }
 0x30f   :  { %887 = vmatmul.msk.f32.gmra.mxu2 %vm485_vm3, %v567_v30  ;;  %v792_v8 = vsel %vm791_vm12, %v971_v1, %v790_v7 }
 0x337   :  { %v634_v31 = vpop.f32.mrf.mxu3 }
 0x338   :  { %712 = vrot.lane.b32.xlu2 %v634_v31, %s1130_s22  ;;  %v936_v31 = vld [vmem:[%s1385_s8] ss:$0 sm:$0xff]  ;;  %s1145_s8 = smov [#allocation11]  }
 0x339   :  { %s849_s11 = sshll.u32 %s1145_s8, 4  ;;  %s850_s11 = int_to_ptr.vmem [resolvable:$true] %s849_s11 }
 0x34c   :  { %v637_v32 = vpop.f32.mrf.mxu3 }
 0x34d   :  { %v704_v33 = vpop.f32.mrf.mxu1  ;;  %714 = vrot.lane.b32.xlu2 %v637_v32, %s1130_s22 }
 0x34e   :  { %728 = vrot.lane.b32.xlu1 %v704_v33, %s1142_s5 }
 0x355   :  { %v669_v34 = vpop.f32.mrf.mxu0  ;;  %v707_v35 = vpop.f32.mrf.mxu1 }
 0x356   :  { %730 = vrot.lane.b32.xlu2 %v707_v35, %s1142_s5  ;;  %720 = vrot.lane.b32.xlu0 %v669_v34, %s1143_s1  ;;  %v937_v35 = vld [vmem:[%s1386_s9] ss:$0 sm:$0xff] }
 0x35d   :  { %v672_v36 = vpop.f32.mrf.mxu0 }
 0x35e   :  { %722 = vrot.lane.b32.xlu0 %v672_v36, %s1143_s1 }
 0x38a   :  { %v597_v42 = vpop.f32.mrf.mxu2 }
 0x392   :  { %v713_v41 = vpop.permute.xlu2 %712  ;;  %v600_v49 = vpop.f32.mrf.mxu2 }
 0x393   :  { %v734_v44 = vsel %vm201_vm1, %v597_v42, %v713_v41 }
 0x3a7   :  { %v715_v43 = vpop.permute.xlu2 %714 }
 0x3a8   :  { %v735_v50 = vsel %vm201_vm1, %v600_v49, %v715_v43 }
 0x3b0   :  { %v731_v52 = vpop.permute.xlu2 %730 }
 0x3c0   :  { %v729_v46 = vpop.permute.xlu1 %728 }
 0x3c8   :  { %v721_v45 = vpop.permute.xlu0 %720 }
 0x3c9   :  { %v736_v47 = vsel %vm485_vm3, %v734_v44, %v721_v45 }
 0x3ca   :  { %v739_v48 = vsel %vm738_vm11, %v736_v47, %v729_v46 }
 0x3cb   :  { %894 = vmatmul.msk.f32.vlgmr.msra.gmra.mxu2 %vm128_vm0, %v739_v48 }
 0x3d0   :  { %v723_v51 = vpop.permute.xlu0 %722 }
 0x3d1   :  { %v737_v53 = vsel %vm485_vm3, %v735_v50, %v723_v51 }
 0x3d2   :  { %v740_v54 = vsel %vm738_vm11, %v737_v53, %v731_v52 }
 0x3d3   :  { %895 = vmatmul.msk.f32.gmra.mxu2 %vm128_vm0, %v740_v54 }
 0x44e   :  { %v772_v56 = vpop.f32.mrf.mxu2 }
 0x44f   :  { %v773_v57 = vadd.f32 %v935_v55, %v772_v56 }
 0x451   :  { %v778_v58 = vadd.f32 %v773_v57, %v1231_v3 }
 0x453   :  { %v780_v59 = vsel %vm128_vm0, %v778_v58, 0.0 }
 0x454   :  { %781 = vadd.xlane.f32.xlu0 %v780_v59 }
 0x456   :  { %v775_v60 = vpop.f32.mrf.mxu2 }
 0x457   :  { %v776_v61 = vadd.f32 %v935_v55, %v775_v60 }
 0x459   :  { %v779_v62 = vadd.f32 %v776_v61, %v1233_v5 }
 0x45b   :  { %v783_v63 = vsel %vm128_vm0, %v779_v62, 0.0 }
 0x45c   :  { %784 = vadd.xlane.f32.xlu2 %v783_v63 }
 0x4c7   :  { %v782_v3 = vpop.xlane.xlu0 %781 }
 0x4c8   :  { %v793_v9 = vmul.f32 %v792_v8, %v782_v3 }
 0x4ca   :  { %v795_v10 = vsub.f32 %v778_v58, %v793_v9 }
 0x4cc   :  { %v797_v11 = vmul.f32 %v795_v10, %v795_v10 }
 0x4ce   :  { %v799_v12 = vsel %vm128_vm0, %v797_v11, 0.0 }
 0x4cf   :  { %v785_v13 = vpop.xlane.xlu2 %784  ;;  %800 = vadd.xlane.f32.xlu1 %v799_v12 }
 0x4d0   :  { %v794_v5 = vmul.f32 %v792_v8, %v785_v13 }
 0x4d2   :  { %v796_v14 = vsub.f32 %v779_v62, %v794_v5 }
 0x4d4   :  { %v798_v15 = vmul.f32 %v796_v14, %v796_v14 }
 0x4d6   :  { %v802_v16 = vsel %vm128_vm0, %v798_v15, 0.0 }
 0x4d7   :  { %803 = vadd.xlane.f32.xlu0 %v802_v16 }
 0x542   :  { %v801_v17 = vpop.xlane.xlu1 %800 }
 0x543   :  { %v805_v18 = vmul.f32 %v801_v17, %v792_v8 }
 0x545   :  { %v807_v19 = vadd.f32 1e-05, %v805_v18 }
 0x547   :  { %972 = vrsqrt.f32 %v807_v19  ;;  %vm815_vm14 = vweird.f32 %v807_v19 }
 0x54a   :  { %v804_v20 = vpop.xlane.xlu0 %803 }
 0x54b   :  { %v806_v21 = vmul.f32 %v804_v20, %v792_v8 }
 0x54d   :  { %v973_v22 = vpop.eup %972  ;;  %v808_v23 = vadd.f32 1e-05, %v806_v21 }
 0x54e   :  { %v810_v24 = vmul.f32 %v973_v22, %v807_v19  ;;  %vm816_vm13 = vweird.f32 %v973_v22 }
 0x54f   :  { %974 = vrsqrt.f32 %v808_v23  ;;  %vm817_vm15 = vmor %vm815_vm14, %vm816_vm13  ;;  %vm825_vm2 = vweird.f32 %v808_v23 }
 0x550   :  { %v811_v25 = vmul.f32 %v973_v22, %v810_v24 }
 0x552   :  { %v812_v27 = vmul.f32 0.5, %v811_v25 }
 0x554   :  { %v813_v28 = vsub.f32 1.5, %v812_v27 }
 0x555   :  { %v975_v29 = vpop.eup %974 }
 0x556   :  { %v814_v26 = vmul.f32 %v973_v22, %v813_v28  ;;  %v820_v30 = vmul.f32 %v975_v29, %v808_v23  ;;  %vm826_vm1 = vweird.f32 %v975_v29 }
 0x557   :  { %vm827_vm3 = vmor %vm825_vm2, %vm826_vm1 }
 0x558   :  { %v818_v32 = vsel %vm817_vm15, %v973_v22, %v814_v26  ;;  %v821_v33 = vmul.f32 %v975_v29, %v820_v30 }
 0x559   :  { %v829_v34 = vmul.f32 %v818_v32, %v795_v10 }
 0x55a   :  { %v822_v36 = vmul.f32 0.5, %v821_v33 }
 0x55b   :  { %v835_v37 = vmul.f32 %v936_v31, %v829_v34 }
 0x55c   :  { %v823_v38 = vsub.f32 1.5, %v822_v36 }
 0x55d   :  { %v841_v39 = vadd.f32 %v937_v35, %v835_v37 }
 0x55e   :  { %v824_v40 = vmul.f32 %v975_v29, %v823_v38 }
 0x55f   :  { %843 = vst.msk [vmem:[#allocation11] sm:$0xff] %vm128_vm0, %v841_v39 }
 0x560   :  { %v828_v41 = vsel %vm827_vm3, %v975_v29, %v824_v40 }
 0x561   :  { %v830_v42 = vmul.f32 %v828_v41, %v796_v14 }
 0x563   :  { %v836_v43 = vmul.f32 %v936_v31, %v830_v42 }
 0x565   :  { %v842_v44 = vadd.f32 %v937_v35, %v836_v43 }
 0x567   :  { %844 = vst.msk [vmem:[#allocation11 + $0x8] sm:$0xff] %vm128_vm0, %v842_v44 }
 0x568   :  { %857 = dma.vmem_to_hbm [thread:$0]  %s850_s11, 256, %s852_s13, [#allocation4], %s1129_s21, %s1129_s21, %s1130_s22  }
 0x569   :  { %1126 = dma.done.wait [#allocation4], 256  }
 0x56a   :  { %1127 = vsyncadd [#allocation4], 4294967040 }
 0x56b   :  { %862 = vsyncpa [#allocation3], 1 }
 0x56c   :  { %863 = vsyncpa [#allocation6], 1 }
 0x56d   :  { %864 = vsyncpa [#allocation9], 1 }
 0x56e   :  { %865 = vsyncpa [#allocation4], 1 }

</bundles_post_ra>
